<compile_context>
chip_gen: v6e
topology: v6e:2x2x1
jax: 0.10.0
libtpu: 0.0.40
codegen_flags: <defaults>
</compile_context>

<pallas_src>
import functools

import jax
import jax.numpy as jnp
from jax import lax
from jax.experimental import pallas as pl
from jax.experimental.pallas import tpu as pltpu

_EPS = 1e-12
_LANE_PAD = 128          # pad score lanes / constant-slab lanes to 128 (dense vst)
_M_LOG_2PI = 1.8378770664093454

# (kernel_size, dilation) for the 5 TDNN layers of xvecTDNN
_LAYER_CFG = ((5, 1), (5, 2), (7, 3), (1, 1), (1, 1))


# ----------------------------------------------------------------------------- #
# One-time enrollment processing: mean subtraction, LDA, length normalization,
# PLDA diagonalizing transform + Kaldi TransformIvector length normalization.
# (Pallas kernel; runs once at setup, NOT per forward.)
# ----------------------------------------------------------------------------- #
def process_xvectors(xv, mean_vec, lda, plda_mean, plda_diag_T, psi):
    N, E = xv.shape
    L = lda.shape[1]
    sqrt_L = float(L) ** 0.5

    def kernel(xv_ref, mean_ref, lda_ref, pmean_ref, P_ref, psi_ref, o_ref):
        x = xv_ref[...] - mean_ref[...]                                     # (N, E)
        iv = jnp.dot(x, lda_ref[...], preferred_element_type=jnp.float32)  # (N, L)
        ss = jnp.sum(iv * iv, axis=1, keepdims=True)
        iv = iv * (sqrt_L * lax.rsqrt(jnp.maximum(ss, _EPS)))              # length norm
        tv = jnp.dot(iv - pmean_ref[...], P_ref[...],
                     preferred_element_type=jnp.float32)                   # PLDA transform
        inv_cov = 1.0 / (1.0 + psi_ref[...])
        dp = jnp.sum(tv * tv * inv_cov, axis=1, keepdims=True)
        o_ref[...] = tv * (sqrt_L * lax.rsqrt(jnp.maximum(dp, _EPS)))      # normalize_length

    return pl.pallas_call(
        kernel,
        out_shape=jax.ShapeDtypeStruct((N, L), jnp.float32),
        grid=(1,),
        in_specs=[pl.BlockSpec((N, E), lambda i: (0, 0)),
                  pl.BlockSpec((1, E), lambda i: (0, 0)),
                  pl.BlockSpec((E, L), lambda i: (0, 0)),
                  pl.BlockSpec((1, L), lambda i: (0, 0)),
                  pl.BlockSpec((L, L), lambda i: (0, 0)),
                  pl.BlockSpec((1, L), lambda i: (0, 0))],
        out_specs=pl.BlockSpec((N, L), lambda i: (0, 0)),
    )(xv, mean_vec, lda, plda_mean, plda_diag_T, psi)


# ----------------------------------------------------------------------------- #
# One-time parameter preprocessing (pure function of constant params):
#   * weight repacking (layer-1 im2col, per-tap 3D weights, K=1 layers as 2D)
#   * bf16 (or f32) cast of the TDNN / fc1 matmul weights
#   * enrollment x-vectors -> PLDA space (Pallas kernel above)
#   * speaker-only PLDA LLR constants + all small row vectors packed into one slab
# ----------------------------------------------------------------------------- #
def prepare_inference(params, mm_dtype=jnp.bfloat16):
    ip = {}
    n_layers = len(_LAYER_CFG)

    # --- TDNN / fc1 weights at the matmul-operand dtype -----------------------
    for i in range(1, n_layers + 1):
        w = params[f"w{i}"].astype(mm_dtype)                 # (K, C_in, C_out)
        K = w.shape[0]
        if i == 1:
            ip["w1"] = jnp.reshape(w, (K * w.shape[1], w.shape[2]))  # im2col (hoisted)
        elif K == 1:
            ip[f"w{i}"] = w[0]                               # (C_in, C_out)
        else:
            ip[f"w{i}"] = w                                  # (K, C_in, C_out)
    ip["fc1_w"] = params["fc1_w"].astype(mm_dtype)

    # accuracy-sensitive back-half matrices stay f32 (they are tiny)
    ip["lda"] = params["lda"]
    ip["plda_diag_T"] = params["plda_diag_T"]

    # --- enroll x-vectors -> PLDA space (Pallas, once) -------------------------
    enroll_t = process_xvectors(params["enroll_xv"], params["mean_vec"], params["lda"],
                                params["plda_mean"], params["plda_diag_T"], params["psi"])

    psi = params["psi"]                                      # (1, L)
    L = psi.shape[1]
    N = enroll_t.shape[0]
    r = psi / (1.0 + psi)
    mean = enroll_t * r                                      # n = 1 utt per speaker
    var_g = 1.0 + r
    var_wo = 1.0 + psi
    inv_g = 1.0 / var_g
    inv_wo = 1.0 / var_wo
    logdet_g = jnp.sum(jnp.log(var_g))
    logdet_wo = jnp.sum(jnp.log(var_wo))
    m2 = jnp.sum(mean * mean * inv_g, axis=1)                # (N,)
    # score(t, n) = C[n] + t . (mean[n]*inv_g) + 0.5 * sum_l t_l^2 * (inv_wo - inv_g)_l
    C = -0.5 * (logdet_g - logdet_wo) - 0.5 * m2             # (N,)   (M_LOG_2PI cancels)
    A_t = jnp.transpose(mean * inv_g)                        # (L, N)
    ip["At_pad"] = jnp.zeros((L, _LANE_PAD), jnp.float32).at[:, :N].set(A_t)

    # fold the two mean subtractions into constant bias rows (removes 2 inputs + 2 subs)
    lda_bias = -(params["mean_vec"] @ params["lda"])                 # (1, L)
    plda_bias = -(params["plda_mean"] @ params["plda_diag_T"])       # (1, L)

    def _pad_row(a):
        a = a.astype(jnp.float32)
        return jnp.pad(a, ((0, 0), (0, _LANE_PAD - a.shape[1])))

    # --- pack every small row vector into ONE lane-padded constant slab --------
    rows, row_of, r_idx = [], {}, 0
    for i in range(1, n_layers + 1):
        bss = jnp.concatenate([params[f"b{i}"], params[f"bn{i}_scale"],
                               params[f"bn{i}_shift"]], axis=0)      # (3, C_out)
        rows.append(_pad_row(bss)); row_of[f"bss{i}"] = r_idx; r_idx += 3
    for name, a in (("fc1_b", params["fc1_b"]), ("lda_b", lda_bias),
                    ("plda_b", plda_bias), ("inv_wo", inv_wo), ("d", inv_wo - inv_g)):
        rows.append(_pad_row(a)); row_of[name] = r_idx; r_idx += 1
    c_row = jnp.zeros((1, _LANE_PAD), jnp.float32).at[0, :N].set(C)
    rows.append(c_row); row_of["C"] = r_idx; r_idx += 1
    slab = jnp.concatenate(rows, axis=0)
    slab = jnp.pad(slab, ((0, (-slab.shape[0]) % 8), (0, 0)))        # 8-sublane aligned
    ip["slab"] = slab
    ip["slab_rows"] = row_of
    ip["num_spks"] = int(N)
    return ip


# ----------------------------------------------------------------------------- #
# Fused forward kernel: per grid block of Bt utterances compute
#   TDNN1..5 (layer-1 hoisted im2col matmul; dilated layers = per-tap matmuls,
#   f32 accumulate; bias + ReLU + folded eval BN) -> one-pass stats pooling -> fc1
#   -> LDA(+folded mean) -> length norm -> PLDA transform(+folded mean) -> length norm
#   -> PLDA log-likelihood-ratio scores against enrolled speakers.
# All intermediates stay in VMEM; only one lane-padded (Bt,128) score slab is stored.
# ----------------------------------------------------------------------------- #
def fused_forward_scores(x_packed, ip, bt):
    B_pad, T1, KF = x_packed.shape
    L = ip["lda"].shape[1]
    NP = _LANE_PAD
    sqrt_L = float(L) ** 0.5
    rows = ip["slab_rows"]
    n_layers = len(_LAYER_CFG)

    # static per-layer output lengths (layer-1 im2col is hoisted: its T_out == T1)
    t_outs = [T1]
    for (K, dil) in _LAYER_CFG[1:]:
        t_outs.append(t_outs[-1] - dil * (K - 1))
    T_final = t_outs[-1]
    inv_T = 1.0 / float(T_final)
    inv_Tm1 = 1.0 / float(T_final - 1)

    def kernel(x_ref, w1, w2, w3, w4, w5, fcw, lda_ref, P_ref, At_ref, slab_ref, o_ref):
        ws = (w1, w2, w3, w4, w5)

        stats_rows = []
        for b in range(bt):                                    # static unroll over batch tile
            h = x_ref[b]                                       # (T1, K1*F) f32
            for li in range(n_layers):
                K, dil = _LAYER_CFG[li]
                T_out = t_outs[li]
                w_ref = ws[li]
                c_out = w_ref.shape[-1]
                mmdt = w_ref.dtype
                if li == 0 or K == 1:
                    # layer 1: wrapper already packed the K taps along lanes -> one matmul
                    y = jnp.dot(h.astype(mmdt), w_ref[...],
                                preferred_element_type=jnp.float32)
                else:
                    # dilated conv = per-tap MXU matmuls, f32 accumulate
                    # (avoids the unaligned lane-concat / XLU shifts of in-kernel im2col)
                    y = jnp.dot(h[0:T_out, :].astype(mmdt), w_ref[0],
                                preferred_element_type=jnp.float32)
                    for k in range(1, K):
                        y = y + jnp.dot(h[k * dil:k * dil + T_out, :].astype(mmdt),
                                        w_ref[k], preferred_element_type=jnp.float32)
                r0 = rows[f"bss{li + 1}"]
                bss = slab_ref[r0:r0 + 3, 0:c_out]             # [bias; bn_scale; bn_shift]
                y = jnp.maximum(y + bss[0:1, :], 0.0)          # conv bias + ReLU
                h = y * bss[1:2, :] + bss[2:3, :]              # folded eval BN

            # one-pass statistics pooling: mean + unbiased std over time
            s1 = jnp.sum(h, axis=0, keepdims=True)             # (1, C5)
            s2 = jnp.sum(h * h, axis=0, keepdims=True)
            m = s1 * inv_T
            var = (s2 - float(T_final) * m * m) * inv_Tm1
            sd = jnp.sqrt(jnp.maximum(var, 0.0))
            stats_rows.append(jnp.concatenate([m, sd], axis=1))  # (1, 2*C5)

        stats = jnp.concatenate(stats_rows, axis=0)              # (Bt, 2*C5)

        E = lda_ref.shape[0]
        fc1_b = slab_ref[rows["fc1_b"]:rows["fc1_b"] + 1, 0:E]
        lda_b = slab_ref[rows["lda_b"]:rows["lda_b"] + 1, 0:L]
        plda_b = slab_ref[rows["plda_b"]:rows["plda_b"] + 1, 0:L]
        inv_wo = slab_ref[rows["inv_wo"]:rows["inv_wo"] + 1, 0:L]
        dvec = slab_ref[rows["d"]:rows["d"] + 1, 0:L]
        c_row = slab_ref[rows["C"]:rows["C"] + 1, :]

        # fc1 -> x-vector;  (xv - mean_vec) @ lda folded into lda_b;  length norm;
        # (iv - plda_mean) @ P folded into plda_b;  Kaldi length normalization.
        xv = jnp.dot(stats.astype(fcw.dtype), fcw[...],
                     preferred_element_type=jnp.float32) + fc1_b              # (Bt, E)
        iv = jnp.dot(xv, lda_ref[...], preferred_element_type=jnp.float32) + lda_b
        ss = jnp.sum(iv * iv, axis=1, keepdims=True)
        iv = iv * (sqrt_L * lax.rsqrt(jnp.maximum(ss, _EPS)))
        tv = jnp.dot(iv, P_ref[...], preferred_element_type=jnp.float32) + plda_b
        dp = jnp.sum(tv * tv * inv_wo, axis=1, keepdims=True)
        t = tv * (sqrt_L * lax.rsqrt(jnp.maximum(dp, _EPS)))                  # (Bt, L)

        # PLDA LLR scores vs enrolled speakers (precomputed constants, lane-padded)
        cross = jnp.dot(t, At_ref[...], preferred_element_type=jnp.float32)   # (Bt, 128)
        quad = 0.5 * jnp.sum(t * t * dvec, axis=1, keepdims=True)             # (Bt, 1)
        # lanes >= num_spks carry the broadcast `quad` term; wrapper slices them off.
        o_ref[...] = c_row + cross + quad

    bcast_args = [ip["w1"], ip["w2"], ip["w3"], ip["w4"], ip["w5"], ip["fc1_w"],
                  ip["lda"], ip["plda_diag_T"], ip["At_pad"], ip["slab"]]

    def _bcast(shape):
        nd = len(shape)
        return pl.BlockSpec(shape, lambda i, _nd=nd: (0,) * _nd)

    grid = B_pad // bt
    return pl.pallas_call(
        kernel,
        out_shape=jax.ShapeDtypeStruct((B_pad, NP), jnp.float32),
        grid=(grid,),
        in_specs=[pl.BlockSpec((bt, T1, KF), lambda i: (i, 0, 0))]
                 + [_bcast(a.shape) for a in bcast_args],
        out_specs=pl.BlockSpec((bt, NP), lambda i: (i, 0)),
        compiler_params=pltpu.CompilerParams(dimension_semantics=("parallel",)),
    )(x_packed, *bcast_args)


def _batch_tile(batch):
    # >= 2 grid blocks (keeps both v7x TensorCores busy) while packing up to 8
    # utterances per block (amortizes per-step overhead; (8,128) unmasked score
    # stores and M=8 back-half matmuls once batch >= 16).
    if batch <= 1:
        return 1
    return min(8, pl.cdiv(batch, 2))


# ----------------------------------------------------------------------------- #
# Full forward:  xvector_PLDA.forward(audios) == helper.score(audios, enroll_iv)
# ----------------------------------------------------------------------------- #
def xvector_plda_forward(feats_ncw, ip):
    # feats_ncw: (B, feat_dim, T) — PyTorch Conv1d NCW layout
    B = feats_ncw.shape[0]
    K1, d1 = _LAYER_CFG[0]
    x = jnp.transpose(feats_ncw, (0, 2, 1))                  # -> (B, T, feat_dim)
    T_in = x.shape[1]
    T1 = T_in - d1 * (K1 - 1)
    # layer-1 im2col hoisted into XLA: packed (B, T1, K1*F), hidden behind the
    # BlockSpec input DMA instead of per-utterance slicing inside the kernel.
    x_packed = jnp.concatenate([x[:, k * d1:k * d1 + T1, :] for k in range(K1)], axis=-1)
    bt = _batch_tile(B)
    b_pad = pl.cdiv(B, bt) * bt
    if b_pad != B:
        x_packed = jnp.pad(x_packed, ((0, b_pad - B), (0, 0), (0, 0)))
    scores_pad = fused_forward_scores(x_packed, ip, bt)       # (b_pad, 128)
    return scores_pad[:B, :ip["num_spks"]]                    # (B, num_spks)


# ----------------------------------------------------------------------------- #
# Pure-JAX reference (original, un-refactored formulation) for validation.
# ----------------------------------------------------------------------------- #
def _reference_forward(feats_ncw, params):
    hi = jax.lax.Precision.HIGHEST
    x = jnp.transpose(feats_ncw, (0, 2, 1))
    for i, dil in enumerate([c[1] for c in _LAYER_CFG]):
        w = params[f"w{i+1}"]; K = w.shape[0]
        T_out = x.shape[1] - dil * (K - 1)
        acc = jnp.zeros((x.shape[0], T_out, w.shape[2]), jnp.float32)
        for k in range(K):
            acc = acc + jnp.einsum("btc,cd->btd", x[:, k * dil:k * dil + T_out, :],
                                   w[k], precision=hi)
        y = jnp.maximum(acc + params[f"b{i+1}"], 0.0)
        x = y * params[f"bn{i+1}_scale"] + params[f"bn{i+1}_shift"]
    m = jnp.mean(x, axis=1)
    s = jnp.sqrt(jnp.sum((x - m[:, None, :]) ** 2, axis=1) / (x.shape[1] - 1))
    xv = jnp.dot(jnp.concatenate([m, s], axis=1), params["fc1_w"],
                 precision=hi) + params["fc1_b"]
    L = params["lda"].shape[1]

    def proc(v):
        iv = jnp.dot(v - params["mean_vec"], params["lda"], precision=hi)
        iv = iv * (L ** 0.5) / jnp.linalg.norm(iv, axis=1, keepdims=True)
        tv = jnp.dot(iv - params["plda_mean"], params["plda_diag_T"], precision=hi)
        dp = jnp.sum(tv * tv / (1.0 + params["psi"]), axis=1, keepdims=True)
        return tv * jnp.sqrt(L / dp)

    test_t, enroll_t = proc(xv), proc(params["enroll_xv"])
    psi = params["psi"]
    mean = enroll_t * psi / (psi + 1.0)
    var_g, var_wo = 1.0 + psi / (psi + 1.0), 1.0 + psi
    sq_g = jnp.sum((test_t[:, None, :] - mean[None]) ** 2 / var_g, axis=-1)
    ll_g = -0.5 * (jnp.sum(jnp.log(var_g)) + _M_LOG_2PI * L + sq_g)
    sq_w = jnp.sum(test_t * test_t / var_wo, axis=1, keepdims=True)
    ll_w = -0.5 * (jnp.sum(jnp.log(var_wo)) + _M_LOG_2PI * L + sq_w)
    return ll_g - ll_w


# ----------------------------------------------------------------------------- #
# Deterministic synthetic parameters (scaled-down xvecTDNN + PLDA system).
# ----------------------------------------------------------------------------- #
def init_params(key):
    F, H, C5, E, L, N = 30, 64, 128, 64, 32, 4       # feat, hidden, tdnn5, embed, lda, spks
    ks = [c[0] for c in _LAYER_CFG]
    cins = [F, H, H, H, H]
    couts = [H, H, H, H, C5]
    keys = jax.random.split(key, 20)
    p, ki = {}, 0
    for i in range(5):
        p[f"w{i+1}"] = 0.1 * jax.random.normal(keys[ki], (ks[i], cins[i], couts[i]), jnp.float32); ki += 1
        p[f"b{i+1}"] = 0.01 * jax.random.normal(keys[ki], (1, couts[i]), jnp.float32); ki += 1
        p[f"bn{i+1}_scale"] = jnp.ones((1, couts[i]), jnp.float32)    # folded eval BN
        p[f"bn{i+1}_shift"] = jnp.zeros((1, couts[i]), jnp.float32)
    p["fc1_w"] = 0.05 * jax.random.normal(keys[ki], (2 * C5, E), jnp.float32); ki += 1
    p["fc1_b"] = 0.01 * jax.random.normal(keys[ki], (1, E), jnp.float32); ki += 1
    p["mean_vec"] = 0.1 * jax.random.normal(keys[ki], (1, E), jnp.float32); ki += 1        # ivector mean
    p["lda"] = 0.1 * jax.random.normal(keys[ki], (E, L), jnp.float32); ki += 1             # transform.txt
    p["plda_mean"] = 0.1 * jax.random.normal(keys[ki], (1, L), jnp.float32); ki += 1
    p["plda_diag_T"] = 0.1 * jax.random.normal(keys[ki], (L, L), jnp.float32); ki += 1     # diagonalizing T^T
    p["psi"] = 0.5 + jnp.abs(jax.random.normal(keys[ki], (1, L), jnp.float32)); ki += 1    # between-class psi
    p["enroll_xv"] = jax.random.normal(keys[ki], (N, E), jnp.float32); ki += 1             # enrolled x-vectors
    return p


if __name__ == "__main__":
    key = jax.random.PRNGKey(0)
    pkey, xkey = jax.random.split(key)
    params = init_params(pkey)

    B, F, T = 16, 30, 64
    feats = jax.random.normal(xkey, (B, F, T), jnp.float32)   # (B, feat_dim, T), NCW

    # one-time setup: enroll-side Pallas processing + parameter repacking
    ip_bf16 = prepare_inference(params, mm_dtype=jnp.bfloat16)   # fast path (v6e/v7x MXU)
    ip_f32 = prepare_inference(params, mm_dtype=jnp.float32)     # tight-validation path

    fwd = jax.jit(functools.partial(xvector_plda_forward, ip=ip_bf16))
    scores = jax.block_until_ready(fwd(feats))

    assert scores.shape == (B, ip_bf16["num_spks"]), scores.shape
    assert bool(jnp.all(jnp.isfinite(scores)))

    ref = _reference_forward(feats, params)

    # f32-operand build must match the f32 reference tightly (exact algorithm check)
    fwd32 = jax.jit(functools.partial(xvector_plda_forward, ip=ip_f32))
    scores32 = jax.block_until_ready(fwd32(feats))
    assert bool(jnp.allclose(scores32, ref, rtol=2e-2, atol=2e-2)), (scores32, ref)

    # bf16 MXU operands introduce ~1% relative error through the TDNN/fc1 matmul chain
    # (f32 accumulation, f32 elementwise); looser check for the fast path.
    assert bool(jnp.allclose(scores, ref, rtol=5e-2, atol=2.5e-1)), (scores, ref)

    print("KERNEL_OK")
</pallas_src>

<mosaic_0001>
module attributes {stable_mosaic.version = 11 : i64} {
  func.func @kernel(%arg0: i32, %arg1: memref<4x64xf32, #tpu.memory_space<vmem>>, %arg2: memref<1x64xf32, #tpu.memory_space<vmem>>, %arg3: memref<64x32xf32, #tpu.memory_space<vmem>>, %arg4: memref<1x32xf32, #tpu.memory_space<vmem>>, %arg5: memref<32x32xf32, #tpu.memory_space<vmem>>, %arg6: memref<1x32xf32, #tpu.memory_space<vmem>>, %arg7: memref<4x32xf32, #tpu.memory_space<vmem>>) attributes {dimension_semantics = [#tpu.dimension_semantics<arbitrary>], iteration_bounds = array<i64: 1>, scalar_prefetch = 0 : i64, scratch_operands = 0 : i64, tpu.core_type = #tpu.core_type<tc>, window_params = [{pipeline_mode = #tpu.pipeline_mode<synchronous>, transform_indices = @transform_0, window_bounds = array<i64: 4, 64>}, {pipeline_mode = #tpu.pipeline_mode<synchronous>, transform_indices = @transform_1, window_bounds = array<i64: 1, 64>}, {pipeline_mode = #tpu.pipeline_mode<synchronous>, transform_indices = @transform_2, window_bounds = array<i64: 64, 32>}, {pipeline_mode = #tpu.pipeline_mode<synchronous>, transform_indices = @transform_3, window_bounds = array<i64: 1, 32>}, {pipeline_mode = #tpu.pipeline_mode<synchronous>, transform_indices = @transform_4, window_bounds = array<i64: 32, 32>}, {pipeline_mode = #tpu.pipeline_mode<synchronous>, transform_indices = @transform_5, window_bounds = array<i64: 1, 32>}, {pipeline_mode = #tpu.pipeline_mode<synchronous>, transform_indices = @transform_6, window_bounds = array<i64: 4, 32>}]} {
    %c0 = arith.constant 0 : index
    %c0_0 = arith.constant 0 : index
    %0 = vector.load %arg1[%c0, %c0_0] : memref<4x64xf32, #tpu.memory_space<vmem>>, vector<4x64xf32>
    %c0_1 = arith.constant 0 : index
    %c0_2 = arith.constant 0 : index
    %1 = vector.load %arg2[%c0_1, %c0_2] : memref<1x64xf32, #tpu.memory_space<vmem>>, vector<1x64xf32>
    %2 = vector.broadcast %1 : vector<1x64xf32> to vector<4x64xf32>
    %3 = arith.subf %0, %2 : vector<4x64xf32>
    %c0_3 = arith.constant 0 : index
    %c0_4 = arith.constant 0 : index
    %4 = vector.load %arg3[%c0_3, %c0_4] : memref<64x32xf32, #tpu.memory_space<vmem>>, vector<64x32xf32>
    %cst = arith.constant dense<0.000000e+00> : vector<4x32xf32>
    %5 = tpu.matmul %3, %4, %cst {dimension_numbers = #tpu.dot_dimension_numbers<[1], [0], [0], [1], [0, 0, 1, 1], [], []>} : vector<4x64xf32>, vector<64x32xf32>, vector<4x32xf32> -> vector<4x32xf32>
    %6 = arith.mulf %5, %5 : vector<4x32xf32>
    %cst_5 = arith.constant dense<0.000000e+00> : vector<4xf32>
    %7 = vector.multi_reduction <add>, %6, %cst_5 [1] : vector<4x32xf32> to vector<4xf32>
    %8 = vector.shape_cast %7 : vector<4xf32> to vector<4x1xf32>
    %cst_6 = arith.constant 9.99999996E-13 : f32
    %9 = vector.broadcast %cst_6 : f32 to vector<4x1xf32>
    %10 = arith.maximumf %8, %9 : vector<4x1xf32>
    %11 = math.rsqrt %10 : vector<4x1xf32>
    %cst_7 = arith.constant 5.65685415 : f32
    %12 = vector.broadcast %cst_7 : f32 to vector<4x1xf32>
    %13 = arith.mulf %12, %11 : vector<4x1xf32>
    %14 = vector.broadcast %13 : vector<4x1xf32> to vector<4x32xf32>
    %15 = arith.mulf %5, %14 : vector<4x32xf32>
    %c0_8 = arith.constant 0 : index
    %c0_9 = arith.constant 0 : index
    %16 = vector.load %arg4[%c0_8, %c0_9] : memref<1x32xf32, #tpu.memory_space<vmem>>, vector<1x32xf32>
    %17 = vector.broadcast %16 : vector<1x32xf32> to vector<4x32xf32>
    %18 = arith.subf %15, %17 : vector<4x32xf32>
    %c0_10 = arith.constant 0 : index
    %c0_11 = arith.constant 0 : index
    %19 = vector.load %arg5[%c0_10, %c0_11] : memref<32x32xf32, #tpu.memory_space<vmem>>, vector<32x32xf32>
    %cst_12 = arith.constant dense<0.000000e+00> : vector<4x32xf32>
    %20 = tpu.matmul %18, %19, %cst_12 {dimension_numbers = #tpu.dot_dimension_numbers<[1], [0], [0], [1], [0, 0, 1, 1], [], []>} : vector<4x32xf32>, vector<32x32xf32>, vector<4x32xf32> -> vector<4x32xf32>
    %c0_13 = arith.constant 0 : index
    %c0_14 = arith.constant 0 : index
    %21 = vector.load %arg6[%c0_13, %c0_14] : memref<1x32xf32, #tpu.memory_space<vmem>>, vector<1x32xf32>
    %cst_15 = arith.constant 1.000000e+00 : f32
    %22 = vector.broadcast %cst_15 : f32 to vector<1x32xf32>
    %23 = arith.addf %22, %21 : vector<1x32xf32>
    %cst_16 = arith.constant 1.000000e+00 : f32
    %24 = vector.broadcast %cst_16 : f32 to vector<1x32xf32>
    %25 = arith.divf %24, %23 : vector<1x32xf32>
    %26 = arith.mulf %20, %20 : vector<4x32xf32>
    %27 = vector.broadcast %25 : vector<1x32xf32> to vector<4x32xf32>
    %28 = arith.mulf %26, %27 : vector<4x32xf32>
    %cst_17 = arith.constant dense<0.000000e+00> : vector<4xf32>
    %29 = vector.multi_reduction <add>, %28, %cst_17 [1] : vector<4x32xf32> to vector<4xf32>
    %30 = vector.shape_cast %29 : vector<4xf32> to vector<4x1xf32>
    %cst_18 = arith.constant 9.99999996E-13 : f32
    %31 = vector.broadcast %cst_18 : f32 to vector<4x1xf32>
    %32 = arith.maximumf %30, %31 : vector<4x1xf32>
    %33 = math.rsqrt %32 : vector<4x1xf32>
    %cst_19 = arith.constant 5.65685415 : f32
    %34 = vector.broadcast %cst_19 : f32 to vector<4x1xf32>
    %35 = arith.mulf %34, %33 : vector<4x1xf32>
    %36 = vector.broadcast %35 : vector<4x1xf32> to vector<4x32xf32>
    %37 = arith.mulf %20, %36 : vector<4x32xf32>
    %c0_20 = arith.constant 0 : index
    %c0_21 = arith.constant 0 : index
    %38 = vector.load %arg7[%c0_20, %c0_21] : memref<4x32xf32, #tpu.memory_space<vmem>>, vector<4x32xf32>
    tpu.vector_store %arg7[%c0_20, %c0_21], %37 {strides = array<i32>} : memref<4x32xf32, #tpu.memory_space<vmem>>, vector<4x32xf32>,
    return
  }
  func.func @transform_0(%arg0: i32) -> (i32, i32) {
    %c0_i32 = arith.constant 0 : i32
    %c0_i32_0 = arith.constant 0 : i32
    %c0_i32_1 = arith.constant 0 : i32
    return %c0_i32, %c0_i32_0 : i32, i32
  }
  func.func @transform_1(%arg0: i32) -> (i32, i32) {
    %c0_i32 = arith.constant 0 : i32
    %c0_i32_0 = arith.constant 0 : i32
    %c0_i32_1 = arith.constant 0 : i32
    return %c0_i32, %c0_i32_0 : i32, i32
  }
  func.func @transform_2(%arg0: i32) -> (i32, i32) {
    %c0_i32 = arith.constant 0 : i32
    %c0_i32_0 = arith.constant 0 : i32
    %c0_i32_1 = arith.constant 0 : i32
    return %c0_i32, %c0_i32_0 : i32, i32
  }
  func.func @transform_3(%arg0: i32) -> (i32, i32) {
    %c0_i32 = arith.constant 0 : i32
    %c0_i32_0 = arith.constant 0 : i32
    %c0_i32_1 = arith.constant 0 : i32
    return %c0_i32, %c0_i32_0 : i32, i32
  }
  func.func @transform_4(%arg0: i32) -> (i32, i32) {
    %c0_i32 = arith.constant 0 : i32
    %c0_i32_0 = arith.constant 0 : i32
    %c0_i32_1 = arith.constant 0 : i32
    return %c0_i32, %c0_i32_0 : i32, i32
  }
  func.func @transform_5(%arg0: i32) -> (i32, i32) {
    %c0_i32 = arith.constant 0 : i32
    %c0_i32_0 = arith.constant 0 : i32
    %c0_i32_1 = arith.constant 0 : i32
    return %c0_i32, %c0_i32_0 : i32, i32
  }
  func.func @transform_6(%arg0: i32) -> (i32, i32) {
    %c0_i32 = arith.constant 0 : i32
    %c0_i32_0 = arith.constant 0 : i32
    %c0_i32_1 = arith.constant 0 : i32
    return %c0_i32, %c0_i32_0 : i32, i32
  }
}

</mosaic_0001>

<bundles_post_ra>
// kernel: tpu_custom_call.1
= control target key start
LH: loop header
LB: loop body
LE: loop exit
PB: predicated region body
PF: predicated region fallthrough
CT: control target
= control target key end

     0   :  { %v323_v1 = vmov 0.0   ;;  %vm324_vm0 = vmmov 0   ;;  %s415_s0 = inlined_call_operand.vmem [shape: f32[4,64], index: 0, kind: input, shape index: {}]   ;;  %s416_s1 = inlined_call_operand.vmem [shape: f32[1,64], index: 1, kind: input, shape index: {}]   ;;  %s417_s2 = inlined_call_operand.vmem [shape: f32[64,32], index: 2, kind: input, shape index: {}]   ;;  %s418_s3 = inlined_call_operand.vmem [shape: f32[1,32], index: 3, kind: input, shape index: {}]   ;;  %s419_s4 = inlined_call_operand.vmem [shape: f32[32,32], index: 4, kind: input, shape index: {}]   ;;  %s420_s5 = inlined_call_operand.vmem [shape: f32[1,32], index: 5, kind: input, shape index: {}]   ;;  %s421_s6 = inlined_call_operand.hbm [shape: f32[4,32], index: 6, kind: output, shape index: {}]  }
   0x1   :  { %v40_v0 = vld [vmem:[%s417_s2 + $0x38] sm:$0xff]  ;;  %262 = vmatprep.subr.mxu0 %v323_v1  ;;  %v39_v2 = vld [vmem:[%s417_s2 + $0x30] sm:$0xff]  ;;  %278 = vmatprep.mubr.msk.f32.mxu0 %vm324_vm0, %v323_v1  ;;  %v38_v3 = vld [vmem:[%s417_s2 + $0x28] sm:$0xff] }
   0x2   :  { %263 = vmatpush3.msra.mxu0 %v40_v0  ;;  %281 = vmatprep.subr.mxu1 %v323_v1 }
   0x3   :  { %264 = vmatprep.subr.mxu0 %v323_v1  ;;  %289 = vmatprep.mubr.msk.f32.mxu1 %vm324_vm0, %v323_v1 }
   0x4   :  { %11 = vsyncpa [#allocation3], 0  ;;  %265 = vmatpush3.msra.mxu0 %v39_v2  ;;  %v37_v4 = vld [vmem:[%s417_s2 + $0x20] sm:$0xff]  ;;  %v36_v5 = vld [vmem:[%s417_s2 + $0x18] sm:$0xff]  ;;  %vm41_vm1 = vcmask 523264   ;;  %vm116_vm2 = vcmask 257024   ;;  %v216_v29 = vlaneseq }
   0x5   :  { %266 = vmatprep.subr.mxu0 %v323_v1  ;;  %v35_v6 = vld [vmem:[%s417_s2 + $0x10] sm:$0xff]  ;;  %v24_v7 = vld [vmem:[%s415_s0] sm:$0xf]  ;;  %v34_v9 = vld [vmem:[%s417_s2 + $0x8] sm:$0xff]  ;;  %vm136_vm3 = vcmask 261120  }
   0x6   :  { %267 = vmatpush3.msra.mxu0 %v38_v3  ;;  %v244_v8 = vld [vmem:[%s416_s1] ss:$0 sm:$0xff]  ;;  %v135_v16 = vld [vmem:[%s419_s4 + $0x18] sm:$0xff]  ;;  %v134_v17 = vld [vmem:[%s419_s4 + $0x10] sm:$0xff]  ;;  %v217_v30 = vshrl.u32 %v216_v29, 7 }
   0x7   :  { %268 = vmatprep.subr.mxu0 %v323_v1  ;;  %v33_v10 = vld [vmem:[%s417_s2] sm:$0xff]  ;;  %v32_v11 = vsub.f32 %v24_v7, %v244_v8  ;;  %282 = vmatpush3.msra.mxu1 %v135_v16  ;;  %v133_v18 = vld [vmem:[%s419_s4 + $0x8] sm:$0xff] }
   0x8   :  { %269 = vmatpush3.msra.mxu0 %v37_v4  ;;  %283 = vmatprep.subr.mxu1 %v323_v1  ;;  %v132_v19 = vld [vmem:[%s419_s4] sm:$0xff]  ;;  %v218_v31 = vsub.s32 0, %v217_v30 }
   0x9   :  { %270 = vmatprep.subr.mxu0 %v323_v1  ;;  %284 = vmatpush3.msra.mxu1 %v134_v17  ;;  %v246_v24 = vld [vmem:[%s418_s3] ss:$0 sm:$0xff]  ;;  %s325_s3 = smov [#allocation2]  }
   0xa   :  { %271 = vmatpush3.msra.mxu0 %v36_v5  ;;  %285 = vmatprep.subr.mxu1 %v323_v1  ;;  %v210_v27 = vld [vmem:[%s420_s5] sm:$0x1]  ;;  %s236_s4 = sshll.u32 %s325_s3, 4  ;;  %s237_s4 = int_to_ptr.vmem [resolvable:$true] %s236_s4 }
   0xb   :  { %272 = vmatprep.subr.mxu0 %v323_v1  ;;  %286 = vmatpush3.msra.mxu1 %v133_v18  ;;  %v211_v28 = vadd.f32 1.0, %v210_v27  ;;  %s301_s5 = scalar_lea.vmem %s237_s4, 64  ;;  %p306_p1 = scmp.lt.s32.totalorder %s237_s4, %s237_s4 }
   0xc   :  { %273 = vmatpush3.msra.mxu0 %v35_v6  ;;  %287 = vmatprep.subr.mxu1 %v323_v1  ;;  %p302_p0 = scmp.ne.s32.totalorder %s237_s4, %s301_s5  ;;  %p307_p2 = scmp.lt.s32.totalorder %s301_s5, %s301_s5 }
   0xd   :  { %274 = vmatprep.subr.mxu0 %v323_v1  ;;  %288 = vmatpush3.msra.mxu1 %v132_v19 }
   0xe   :  { %275 = vmatpush3.msra.mxu0 %v34_v9  ;;  %p308_p3 = por %p307_p2, %p306_p1 }
   0xf   :  { %276 = vmatprep.subr.mxu0 %v323_v1 }
  0x10   :  { %277 = vmatpush3.msra.mxu0 %v33_v10  ;;  %p309_p4 = pnand %p308_p3, %p302_p0 }
  0x11   :  { %279 = vmatmul.mubr.msk.f32.vlgmr.msra.gmra.mxu0 %vm41_vm1, %v32_v11 }
  0xd1   :  { %v111_v12 = vpop.f32.mrf.mxu0 }
  0xd2   :  { %v115_v13 = vmul.f32 %v111_v12, %v111_v12 }
  0xd3   :  { %v280_v14 = vpop.f32.mrf.mxu0 }
  0xd4   :  { %v117_v15 = vsel %vm116_vm2, %v115_v13, 0.0 }
  0xd5   :  { %118 = vadd.xlane.f32.xlu0 %v117_v15 }
 0x15e   :  { %v119_v20 = vpop.xlane.xlu0 %118 }
 0x15f   :  { %v120_v21 = vmax.f32 %v119_v20, 1e-12 }
 0x161   :  { %295 = vrsqrt.f32 %v120_v21 }
 0x162   :  { %297 = vrcp.f32 %v211_v28 }
 0x16e   :  { %v296_v22 = vpop.eup %295 }
 0x16f   :  { %v122_v23 = vmul.f32 5.656854, %v296_v22  ;;  %v298_v32 = vpop.eup %297 }
 0x170   :  { %v219_v33 = vrot.slane %v298_v32, %v218_v31 }
 0x171   :  { %v123_v25 = vmul.f32 %v122_v23, %v111_v12 }
 0x173   :  { %v131_v26 = vsub.f32 %v123_v25, %v246_v24 }
 0x175   :  { %290 = vmatmul.mubr.msk.f32.vlgmr.msra.gmra.mxu1 %vm136_vm3, %v131_v26 }
 0x235   :  { %v206_v34 = vpop.f32.mrf.mxu1 }
 0x236   :  { %v214_v35 = vmul.f32 %v206_v34, %v206_v34 }
 0x237   :  { %v291_v36 = vpop.f32.mrf.mxu1 }
 0x238   :  { %v221_v37 = vmul.f32 %v219_v33, %v214_v35 }
 0x23a   :  { %v222_v38 = vsel %vm116_vm2, %v221_v37, 0.0 }
 0x23b   :  { %223 = vadd.xlane.f32.xlu0 %v222_v38 }
 0x2c4   :  { %v224_v39 = vpop.xlane.xlu0 %223 }
 0x2c5   :  { %v225_v40 = vmax.f32 %v224_v39, 1e-12 }
 0x2c7   :  { %299 = vrsqrt.f32 %v225_v40 }
 0x2d4   :  { %v300_v41 = vpop.eup %299 }
 0x2d5   :  { %v227_v42 = vmul.f32 5.656854, %v300_v41 }
 0x2d7   :  { %v228_v43 = vmul.f32 %v227_v42, %v206_v34 }
 0x2d9   :  { %229 = vst.msk [vmem:[#allocation2] sm:$0xf] %vm116_vm2, %v228_v43 }
 0x2da   :  { %312 = shalt.err (!%p309_p4)
}
 0x2db   :  { %239 = dma.vmem_to_hbm [thread:$0]  %s237_s4, 64, %s421_s6, [#allocation3]  }
 0x2dc   :  { %321 = dma.done.wait [#allocation3], 64  }
 0x2dd   :  { %322 = vsyncadd [#allocation3], 4294967232 }
 0x2de   :  { %243 = vsyncpa [#allocation3], 1 }

</bundles_post_ra>
